<compile_context>
chip_gen: v7x
topology: tpu7x:2x2x1
jax: 0.10.0
libtpu: 0.0.40
codegen_flags: <defaults>
</compile_context>

<pallas_src>
import functools

import jax
import jax.numpy as jnp
from jax.experimental import pallas as pl
from jax.experimental.pallas import tpu as pltpu


# --------------------------------------------------------------------------
# Kernels
# --------------------------------------------------------------------------
def _layernorm(x, gamma, beta, eps):
    mu = jnp.mean(x, axis=-1, keepdims=True)
    var = jnp.mean(jnp.square(x - mu), axis=-1, keepdims=True)
    return (x - mu) * jax.lax.rsqrt(var + eps) * gamma + beta


def _encoder_layer_kernel(
    x_ref, wqkv_ref, bqkv_ref, wo_ref, bo_ref,
    ln1_g_ref, ln1_b_ref, w1_ref, b1_ref, w2_ref, b2_ref,
    ln2_g_ref, ln2_b_ref, o_ref, *, num_heads, eps=1e-5,
):
    """One post-LN TransformerEncoderLayer for a single batch row (S, D)."""
    x = x_ref[0]                                  # (S, D), native dtype
    S, D = x.shape
    dh = D // num_heads
    scale = 1.0 / (dh ** 0.5)

    # ---- multi-head self-attention -------------------------------------
    # Fused QKV projection: one MXU matmul, f32 accumulation.
    qkv = jnp.dot(x, wqkv_ref[...], preferred_element_type=jnp.float32)
    qkv = qkv + bqkv_ref[...]                     # (S, 3D) f32
    q = qkv[:, 0 * D:1 * D]
    k = qkv[:, 1 * D:2 * D]
    v = qkv[:, 2 * D:3 * D]

    head_outs = []
    for h in range(num_heads):                    # static unroll (small H)
        sl = slice(h * dh, (h + 1) * dh)
        qh, kh, vh = q[:, sl], k[:, sl], v[:, sl]
        # scores = qh @ kh^T (contract last dims; avoids explicit transpose).
        s = jax.lax.dot_general(
            qh, kh, (((1,), (1,)), ((), ())),
            preferred_element_type=jnp.float32) * scale          # (S, S)
        s = s - jnp.max(s, axis=-1, keepdims=True)
        p = jnp.exp(s)
        p = p / jnp.sum(p, axis=-1, keepdims=True)
        head_outs.append(
            jnp.dot(p, vh, preferred_element_type=jnp.float32))  # (S, dh)
    attn = jnp.concatenate(head_outs, axis=-1)                    # (S, D)
    attn = jnp.dot(attn, wo_ref[...], preferred_element_type=jnp.float32)
    attn = attn + bo_ref[...]

    # ---- residual + LayerNorm1 (post-LN, PyTorch default) ---------------
    h1 = x.astype(jnp.float32) + attn
    h1 = _layernorm(h1, ln1_g_ref[...], ln1_b_ref[...], eps)

    # ---- feed-forward: Linear -> ReLU -> Linear --------------------------
    f = jnp.dot(h1, w1_ref[...], preferred_element_type=jnp.float32)
    f = jnp.maximum(f + b1_ref[...], 0.0)
    f = jnp.dot(f, w2_ref[...], preferred_element_type=jnp.float32)
    f = f + b2_ref[...]

    # ---- residual + LayerNorm2 -------------------------------------------
    h2 = _layernorm(h1 + f, ln2_g_ref[...], ln2_b_ref[...], eps)

    o_ref[0] = h2.astype(o_ref.dtype)


def _pool_head_kernel(x_ref, w_ref, b_ref, u_ref, o_ref, *, dropout_p, training):
    """mean over seq -> Linear(D, 2) -> ReLU -> (inverted) dropout."""
    x = x_ref[...]                                           # (B, S, D)
    pooled = jnp.mean(x.astype(jnp.float32), axis=1)         # (B, D)
    y = jnp.dot(pooled, w_ref[...], preferred_element_type=jnp.float32)
    y = jnp.maximum(y + b_ref[...], 0.0)                     # (B, 2)
    if training and dropout_p > 0.0:
        keep_scale = jnp.float32(1.0 / (1.0 - dropout_p))
        # Fused inverted dropout: keep iff uniform >= p.
        y = jnp.where(u_ref[...] >= jnp.float32(dropout_p), y * keep_scale, 0.0)
    o_ref[...] = y.astype(o_ref.dtype)


# --------------------------------------------------------------------------
# Wrappers
# --------------------------------------------------------------------------
def encoder_layer(x, p, *, num_heads):
    B, S, D = x.shape
    F = p["w1"].shape[1]

    def resident(shape):
        # Full-array block, constant index -> weight stays resident in VMEM.
        return pl.BlockSpec(shape, lambda b, _s=shape: (0,) * len(_s))

    kernel = functools.partial(_encoder_layer_kernel, num_heads=num_heads)
    return pl.pallas_call(
        kernel,
        out_shape=jax.ShapeDtypeStruct((B, S, D), x.dtype),
        grid=(B,),
        in_specs=[
            pl.BlockSpec((1, S, D), lambda b: (b, 0, 0)),    # x: one batch row
            resident((D, 3 * D)), resident((1, 3 * D)),      # QKV proj
            resident((D, D)), resident((1, D)),              # out proj
            resident((1, D)), resident((1, D)),              # LN1 gamma/beta
            resident((D, F)), resident((1, F)),              # FFN linear1
            resident((F, D)), resident((1, D)),              # FFN linear2
            resident((1, D)), resident((1, D)),              # LN2 gamma/beta
        ],
        out_specs=pl.BlockSpec((1, S, D), lambda b: (b, 0, 0)),
        compiler_params=pltpu.CompilerParams(
            dimension_semantics=("parallel",)),
    )(x, p["wqkv"], p["bqkv"], p["wo"], p["bo"],
      p["ln1_g"], p["ln1_b"], p["w1"], p["b1"], p["w2"], p["b2"],
      p["ln2_g"], p["ln2_b"])


def pool_head(x, head_w, head_b, *, dropout_p, training, dropout_key=None):
    B, S, D = x.shape
    if training and dropout_p > 0.0:
        assert dropout_key is not None
        u = jax.random.uniform(dropout_key, (B, 2), dtype=jnp.float32)
    else:
        u = jnp.zeros((B, 2), jnp.float32)

    kernel = functools.partial(
        _pool_head_kernel, dropout_p=float(dropout_p), training=bool(training))
    vmem = pl.BlockSpec(memory_space=pltpu.MemorySpace.VMEM)
    return pl.pallas_call(
        kernel,
        out_shape=jax.ShapeDtypeStruct((B, 2), x.dtype),
        in_specs=[vmem, vmem, vmem, vmem],
        out_specs=vmem,
    )(x, head_w, head_b, u)


def adv_layer_forward(x, params, *, num_heads, dropout_p,
                      training=False, dropout_key=None):
    """Mirrors Adv_Layer.forward: returns (encoded_sequence, head_output)."""
    h = x
    for lp in params["layers"]:
        h = encoder_layer(h, lp, num_heads=num_heads)
    # GRL is identity in the forward pass (gradient reversal is backward-only).
    out = pool_head(h, params["head_w"], params["head_b"],
                    dropout_p=dropout_p, training=training,
                    dropout_key=dropout_key)
    return h, out


# --------------------------------------------------------------------------
# Parameter init (JAX-side equivalent of the nn.Module's parameters)
# --------------------------------------------------------------------------
def init_params(key, d_model, dim_ff, num_layers):
    def linear_init(k, fan_in, shape):
        bound = 1.0 / (fan_in ** 0.5)
        return jax.random.uniform(k, shape, jnp.float32, -bound, bound)

    D, F = d_model, dim_ff
    keys = jax.random.split(key, num_layers + 1)
    layers = []
    for lk in keys[:num_layers]:
        k = jax.random.split(lk, 8)
        layers.append(dict(
            wqkv=linear_init(k[0], D, (D, 3 * D)),
            bqkv=linear_init(k[1], D, (1, 3 * D)),
            wo=linear_init(k[2], D, (D, D)),
            bo=linear_init(k[3], D, (1, D)),
            ln1_g=jnp.ones((1, D), jnp.float32),
            ln1_b=jnp.zeros((1, D), jnp.float32),
            w1=linear_init(k[4], D, (D, F)),
            b1=linear_init(k[5], D, (1, F)),
            w2=linear_init(k[6], F, (F, D)),
            b2=linear_init(k[7], F, (1, D)),
            ln2_g=jnp.ones((1, D), jnp.float32),
            ln2_b=jnp.zeros((1, D), jnp.float32),
        ))
    hk = jax.random.split(keys[-1], 2)
    return {
        "layers": layers,
        "head_w": linear_init(hk[0], D, (D, 2)),
        "head_b": linear_init(hk[1], D, (1, 2)),
    }


# --------------------------------------------------------------------------
# Pure-JAX reference (inference mode) for correctness checking
# --------------------------------------------------------------------------
def ref_forward(x, params, *, num_heads, eps=1e-5):
    def ln(t, g, b):
        mu = t.mean(-1, keepdims=True)
        var = ((t - mu) ** 2).mean(-1, keepdims=True)
        return (t - mu) / jnp.sqrt(var + eps) * g + b

    B, S, D = x.shape
    dh = D // num_heads
    h = x
    for p in params["layers"]:
        qkv = h @ p["wqkv"] + p["bqkv"]
        q, k, v = qkv[..., :D], qkv[..., D:2 * D], qkv[..., 2 * D:]
        q = q.reshape(B, S, num_heads, dh)
        k = k.reshape(B, S, num_heads, dh)
        v = v.reshape(B, S, num_heads, dh)
        s = jnp.einsum("bqhd,bkhd->bhqk", q, k) / jnp.sqrt(dh)
        a = jax.nn.softmax(s, axis=-1)
        o = jnp.einsum("bhqk,bkhd->bqhd", a, v).reshape(B, S, D)
        o = o @ p["wo"] + p["bo"]
        h1 = ln(h + o, p["ln1_g"], p["ln1_b"])
        f = jnp.maximum(h1 @ p["w1"] + p["b1"], 0.0) @ p["w2"] + p["b2"]
        h = ln(h1 + f, p["ln2_g"], p["ln2_b"])
    pooled = h.mean(axis=1)
    out = jnp.maximum(pooled @ params["head_w"] + params["head_b"], 0.0)
    return h, out


# --------------------------------------------------------------------------
# Demo / self-test
# --------------------------------------------------------------------------
if __name__ == "__main__":
    # Small "setting": word_size=64, adv_head_num=4, adv_layer_num=2,
    # dropout_prob=0.1.  (dim_feedforward kept small for the demo;
    # PyTorch's default is 2048 but it is an independent hyperparameter.)
    batch, seq = 2, 8
    word_size, adv_head_num, adv_layer_num = 64, 4, 2
    dim_feedforward = 128
    dropout_prob = 0.1

    root = jax.random.PRNGKey(0)
    kx, kp, kd = jax.random.split(root, 3)
    x = jax.random.normal(kx, (batch, seq, word_size), dtype=jnp.float32)
    params = init_params(kp, word_size, dim_feedforward, adv_layer_num)

    # Training-mode run (exercises the fused dropout path).
    enc, out = adv_layer_forward(
        x, params, num_heads=adv_head_num, dropout_p=dropout_prob,
        training=True, dropout_key=kd)
    enc = jax.block_until_ready(enc)
    out = jax.block_until_ready(out)
    assert enc.shape == (batch, seq, word_size)
    assert out.shape == (batch, 2)

    # Inference-mode run, compared against the pure-JAX reference.
    enc2, out2 = adv_layer_forward(
        x, params, num_heads=adv_head_num, dropout_p=dropout_prob,
        training=False)
    enc2 = jax.block_until_ready(enc2)
    out2 = jax.block_until_ready(out2)
    enc_ref, out_ref = ref_forward(x, params, num_heads=adv_head_num)
    assert jnp.allclose(enc2, enc_ref, atol=1e-2, rtol=1e-2)
    assert jnp.allclose(out2, out_ref, atol=1e-2, rtol=1e-2)

    print("KERNEL_OK")
</pallas_src>

<mosaic_0001>
module attributes {stable_mosaic.version = 11 : i64} {
  func.func @_encoder_layer_kernel(%arg0: i32, %arg1: memref<1x8x64xf32, #tpu.memory_space<vmem>>, %arg2: memref<64x192xf32, #tpu.memory_space<vmem>>, %arg3: memref<1x192xf32, #tpu.memory_space<vmem>>, %arg4: memref<64x64xf32, #tpu.memory_space<vmem>>, %arg5: memref<1x64xf32, #tpu.memory_space<vmem>>, %arg6: memref<1x64xf32, #tpu.memory_space<vmem>>, %arg7: memref<1x64xf32, #tpu.memory_space<vmem>>, %arg8: memref<64x128xf32, #tpu.memory_space<vmem>>, %arg9: memref<1x128xf32, #tpu.memory_space<vmem>>, %arg10: memref<128x64xf32, #tpu.memory_space<vmem>>, %arg11: memref<1x64xf32, #tpu.memory_space<vmem>>, %arg12: memref<1x64xf32, #tpu.memory_space<vmem>>, %arg13: memref<1x64xf32, #tpu.memory_space<vmem>>, %arg14: memref<1x8x64xf32, #tpu.memory_space<vmem>>) attributes {dimension_semantics = [#tpu.dimension_semantics<parallel>], iteration_bounds = array<i64: 2>, scalar_prefetch = 0 : i64, scratch_operands = 0 : i64, tpu.core_type = #tpu.core_type<tc>, window_params = [{transform_indices = @transform_0, window_bounds = array<i64: 1, 8, 64>}, {pipeline_mode = #tpu.pipeline_mode<synchronous>, transform_indices = @transform_1, window_bounds = array<i64: 64, 192>}, {pipeline_mode = #tpu.pipeline_mode<synchronous>, transform_indices = @transform_2, window_bounds = array<i64: 1, 192>}, {pipeline_mode = #tpu.pipeline_mode<synchronous>, transform_indices = @transform_3, window_bounds = array<i64: 64, 64>}, {pipeline_mode = #tpu.pipeline_mode<synchronous>, transform_indices = @transform_4, window_bounds = array<i64: 1, 64>}, {pipeline_mode = #tpu.pipeline_mode<synchronous>, transform_indices = @transform_5, window_bounds = array<i64: 1, 64>}, {pipeline_mode = #tpu.pipeline_mode<synchronous>, transform_indices = @transform_6, window_bounds = array<i64: 1, 64>}, {pipeline_mode = #tpu.pipeline_mode<synchronous>, transform_indices = @transform_7, window_bounds = array<i64: 64, 128>}, {pipeline_mode = #tpu.pipeline_mode<synchronous>, transform_indices = @transform_8, window_bounds = array<i64: 1, 128>}, {pipeline_mode = #tpu.pipeline_mode<synchronous>, transform_indices = @transform_9, window_bounds = array<i64: 128, 64>}, {pipeline_mode = #tpu.pipeline_mode<synchronous>, transform_indices = @transform_10, window_bounds = array<i64: 1, 64>}, {pipeline_mode = #tpu.pipeline_mode<synchronous>, transform_indices = @transform_11, window_bounds = array<i64: 1, 64>}, {pipeline_mode = #tpu.pipeline_mode<synchronous>, transform_indices = @transform_12, window_bounds = array<i64: 1, 64>}, {transform_indices = @transform_13, window_bounds = array<i64: 1, 8, 64>}]} {
    %c0 = arith.constant 0 : index
    %c0_0 = arith.constant 0 : index
    %c0_1 = arith.constant 0 : index
    %0 = vector.load %arg1[%c0, %c0_0, %c0_1] : memref<1x8x64xf32, #tpu.memory_space<vmem>>, vector<1x8x64xf32>
    %1 = vector.shape_cast %0 : vector<1x8x64xf32> to vector<8x64xf32>
    %c0_2 = arith.constant 0 : index
    %c0_3 = arith.constant 0 : index
    %2 = vector.load %arg2[%c0_2, %c0_3] : memref<64x192xf32, #tpu.memory_space<vmem>>, vector<64x192xf32>
    %cst = arith.constant dense<0.000000e+00> : vector<8x192xf32>
    %3 = tpu.matmul %1, %2, %cst {dimension_numbers = #tpu.dot_dimension_numbers<[1], [0], [0], [1], [0, 0, 1, 1], [], []>} : vector<8x64xf32>, vector<64x192xf32>, vector<8x192xf32> -> vector<8x192xf32>
    %c0_4 = arith.constant 0 : index
    %c0_5 = arith.constant 0 : index
    %4 = vector.load %arg3[%c0_4, %c0_5] : memref<1x192xf32, #tpu.memory_space<vmem>>, vector<1x192xf32>
    %5 = vector.broadcast %4 : vector<1x192xf32> to vector<8x192xf32>
    %6 = arith.addf %3, %5 : vector<8x192xf32>
    %7 = vector.extract_strided_slice %6 {offsets = [0, 0], sizes = [8, 64], strides = [1, 1]} : vector<8x192xf32> to vector<8x64xf32>
    %8 = vector.extract_strided_slice %6 {offsets = [0, 64], sizes = [8, 64], strides = [1, 1]} : vector<8x192xf32> to vector<8x64xf32>
    %9 = vector.extract_strided_slice %6 {offsets = [0, 128], sizes = [8, 64], strides = [1, 1]} : vector<8x192xf32> to vector<8x64xf32>
    %10 = vector.extract_strided_slice %7 {offsets = [0, 0], sizes = [8, 16], strides = [1, 1]} : vector<8x64xf32> to vector<8x16xf32>
    %11 = vector.extract_strided_slice %8 {offsets = [0, 0], sizes = [8, 16], strides = [1, 1]} : vector<8x64xf32> to vector<8x16xf32>
    %12 = vector.extract_strided_slice %9 {offsets = [0, 0], sizes = [8, 16], strides = [1, 1]} : vector<8x64xf32> to vector<8x16xf32>
    %cst_6 = arith.constant dense<0.000000e+00> : vector<8x8xf32>
    %13 = tpu.matmul %10, %11, %cst_6 {dimension_numbers = #tpu.dot_dimension_numbers<[1], [1], [0], [0], [0, 0, 1, 0], [], []>} : vector<8x16xf32>, vector<8x16xf32>, vector<8x8xf32> -> vector<8x8xf32>
    %cst_7 = arith.constant 2.500000e-01 : f32
    %14 = vector.broadcast %cst_7 : f32 to vector<8x8xf32>
    %15 = arith.mulf %13, %14 : vector<8x8xf32>
    %cst_8 = arith.constant dense<0xFF800000> : vector<8xf32>
    %16 = vector.multi_reduction <maximumf>, %15, %cst_8 [1] : vector<8x8xf32> to vector<8xf32>
    %17 = vector.shape_cast %16 : vector<8xf32> to vector<8x1xf32>
    %18 = vector.broadcast %17 : vector<8x1xf32> to vector<8x8xf32>
    %19 = arith.subf %15, %18 : vector<8x8xf32>
    %20 = math.exp %19 : vector<8x8xf32>
    %cst_9 = arith.constant dense<0.000000e+00> : vector<8xf32>
    %21 = vector.multi_reduction <add>, %20, %cst_9 [1] : vector<8x8xf32> to vector<8xf32>
    %22 = vector.shape_cast %21 : vector<8xf32> to vector<8x1xf32>
    %23 = vector.broadcast %22 : vector<8x1xf32> to vector<8x8xf32>
    %24 = arith.divf %20, %23 : vector<8x8xf32>
    %cst_10 = arith.constant dense<0.000000e+00> : vector<8x16xf32>
    %25 = tpu.matmul %24, %12, %cst_10 {dimension_numbers = #tpu.dot_dimension_numbers<[1], [0], [0], [1], [0, 0, 1, 1], [], []>} : vector<8x8xf32>, vector<8x16xf32>, vector<8x16xf32> -> vector<8x16xf32>
    %26 = vector.extract_strided_slice %7 {offsets = [0, 16], sizes = [8, 16], strides = [1, 1]} : vector<8x64xf32> to vector<8x16xf32>
    %27 = vector.extract_strided_slice %8 {offsets = [0, 16], sizes = [8, 16], strides = [1, 1]} : vector<8x64xf32> to vector<8x16xf32>
    %28 = vector.extract_strided_slice %9 {offsets = [0, 16], sizes = [8, 16], strides = [1, 1]} : vector<8x64xf32> to vector<8x16xf32>
    %cst_11 = arith.constant dense<0.000000e+00> : vector<8x8xf32>
    %29 = tpu.matmul %26, %27, %cst_11 {dimension_numbers = #tpu.dot_dimension_numbers<[1], [1], [0], [0], [0, 0, 1, 0], [], []>} : vector<8x16xf32>, vector<8x16xf32>, vector<8x8xf32> -> vector<8x8xf32>
    %cst_12 = arith.constant 2.500000e-01 : f32
    %30 = vector.broadcast %cst_12 : f32 to vector<8x8xf32>
    %31 = arith.mulf %29, %30 : vector<8x8xf32>
    %cst_13 = arith.constant dense<0xFF800000> : vector<8xf32>
    %32 = vector.multi_reduction <maximumf>, %31, %cst_13 [1] : vector<8x8xf32> to vector<8xf32>
    %33 = vector.shape_cast %32 : vector<8xf32> to vector<8x1xf32>
    %34 = vector.broadcast %33 : vector<8x1xf32> to vector<8x8xf32>
    %35 = arith.subf %31, %34 : vector<8x8xf32>
    %36 = math.exp %35 : vector<8x8xf32>
    %cst_14 = arith.constant dense<0.000000e+00> : vector<8xf32>
    %37 = vector.multi_reduction <add>, %36, %cst_14 [1] : vector<8x8xf32> to vector<8xf32>
    %38 = vector.shape_cast %37 : vector<8xf32> to vector<8x1xf32>
    %39 = vector.broadcast %38 : vector<8x1xf32> to vector<8x8xf32>
    %40 = arith.divf %36, %39 : vector<8x8xf32>
    %cst_15 = arith.constant dense<0.000000e+00> : vector<8x16xf32>
    %41 = tpu.matmul %40, %28, %cst_15 {dimension_numbers = #tpu.dot_dimension_numbers<[1], [0], [0], [1], [0, 0, 1, 1], [], []>} : vector<8x8xf32>, vector<8x16xf32>, vector<8x16xf32> -> vector<8x16xf32>
    %42 = vector.extract_strided_slice %7 {offsets = [0, 32], sizes = [8, 16], strides = [1, 1]} : vector<8x64xf32> to vector<8x16xf32>
    %43 = vector.extract_strided_slice %8 {offsets = [0, 32], sizes = [8, 16], strides = [1, 1]} : vector<8x64xf32> to vector<8x16xf32>
    %44 = vector.extract_strided_slice %9 {offsets = [0, 32], sizes = [8, 16], strides = [1, 1]} : vector<8x64xf32> to vector<8x16xf32>
    %cst_16 = arith.constant dense<0.000000e+00> : vector<8x8xf32>
    %45 = tpu.matmul %42, %43, %cst_16 {dimension_numbers = #tpu.dot_dimension_numbers<[1], [1], [0], [0], [0, 0, 1, 0], [], []>} : vector<8x16xf32>, vector<8x16xf32>, vector<8x8xf32> -> vector<8x8xf32>
    %cst_17 = arith.constant 2.500000e-01 : f32
    %46 = vector.broadcast %cst_17 : f32 to vector<8x8xf32>
    %47 = arith.mulf %45, %46 : vector<8x8xf32>
    %cst_18 = arith.constant dense<0xFF800000> : vector<8xf32>
    %48 = vector.multi_reduction <maximumf>, %47, %cst_18 [1] : vector<8x8xf32> to vector<8xf32>
    %49 = vector.shape_cast %48 : vector<8xf32> to vector<8x1xf32>
    %50 = vector.broadcast %49 : vector<8x1xf32> to vector<8x8xf32>
    %51 = arith.subf %47, %50 : vector<8x8xf32>
    %52 = math.exp %51 : vector<8x8xf32>
    %cst_19 = arith.constant dense<0.000000e+00> : vector<8xf32>
    %53 = vector.multi_reduction <add>, %52, %cst_19 [1] : vector<8x8xf32> to vector<8xf32>
    %54 = vector.shape_cast %53 : vector<8xf32> to vector<8x1xf32>
    %55 = vector.broadcast %54 : vector<8x1xf32> to vector<8x8xf32>
    %56 = arith.divf %52, %55 : vector<8x8xf32>
    %cst_20 = arith.constant dense<0.000000e+00> : vector<8x16xf32>
    %57 = tpu.matmul %56, %44, %cst_20 {dimension_numbers = #tpu.dot_dimension_numbers<[1], [0], [0], [1], [0, 0, 1, 1], [], []>} : vector<8x8xf32>, vector<8x16xf32>, vector<8x16xf32> -> vector<8x16xf32>
    %58 = vector.extract_strided_slice %7 {offsets = [0, 48], sizes = [8, 16], strides = [1, 1]} : vector<8x64xf32> to vector<8x16xf32>
    %59 = vector.extract_strided_slice %8 {offsets = [0, 48], sizes = [8, 16], strides = [1, 1]} : vector<8x64xf32> to vector<8x16xf32>
    %60 = vector.extract_strided_slice %9 {offsets = [0, 48], sizes = [8, 16], strides = [1, 1]} : vector<8x64xf32> to vector<8x16xf32>
    %cst_21 = arith.constant dense<0.000000e+00> : vector<8x8xf32>
    %61 = tpu.matmul %58, %59, %cst_21 {dimension_numbers = #tpu.dot_dimension_numbers<[1], [1], [0], [0], [0, 0, 1, 0], [], []>} : vector<8x16xf32>, vector<8x16xf32>, vector<8x8xf32> -> vector<8x8xf32>
    %cst_22 = arith.constant 2.500000e-01 : f32
    %62 = vector.broadcast %cst_22 : f32 to vector<8x8xf32>
    %63 = arith.mulf %61, %62 : vector<8x8xf32>
    %cst_23 = arith.constant dense<0xFF800000> : vector<8xf32>
    %64 = vector.multi_reduction <maximumf>, %63, %cst_23 [1] : vector<8x8xf32> to vector<8xf32>
    %65 = vector.shape_cast %64 : vector<8xf32> to vector<8x1xf32>
    %66 = vector.broadcast %65 : vector<8x1xf32> to vector<8x8xf32>
    %67 = arith.subf %63, %66 : vector<8x8xf32>
    %68 = math.exp %67 : vector<8x8xf32>
    %cst_24 = arith.constant dense<0.000000e+00> : vector<8xf32>
    %69 = vector.multi_reduction <add>, %68, %cst_24 [1] : vector<8x8xf32> to vector<8xf32>
    %70 = vector.shape_cast %69 : vector<8xf32> to vector<8x1xf32>
    %71 = vector.broadcast %70 : vector<8x1xf32> to vector<8x8xf32>
    %72 = arith.divf %68, %71 : vector<8x8xf32>
    %cst_25 = arith.constant dense<0.000000e+00> : vector<8x16xf32>
    %73 = tpu.matmul %72, %60, %cst_25 {dimension_numbers = #tpu.dot_dimension_numbers<[1], [0], [0], [1], [0, 0, 1, 1], [], []>} : vector<8x8xf32>, vector<8x16xf32>, vector<8x16xf32> -> vector<8x16xf32>
    %74 = tpu.concatenate %25, %41, %57, %73 in 1 : vector<8x16xf32>, vector<8x16xf32>, vector<8x16xf32>, vector<8x16xf32> -> vector<8x64xf32>
    %c0_26 = arith.constant 0 : index
    %c0_27 = arith.constant 0 : index
    %75 = vector.load %arg4[%c0_26, %c0_27] : memref<64x64xf32, #tpu.memory_space<vmem>>, vector<64x64xf32>
    %cst_28 = arith.constant dense<0.000000e+00> : vector<8x64xf32>
    %76 = tpu.matmul %74, %75, %cst_28 {dimension_numbers = #tpu.dot_dimension_numbers<[1], [0], [0], [1], [0, 0, 1, 1], [], []>} : vector<8x64xf32>, vector<64x64xf32>, vector<8x64xf32> -> vector<8x64xf32>
    %c0_29 = arith.constant 0 : index
    %c0_30 = arith.constant 0 : index
    %77 = vector.load %arg5[%c0_29, %c0_30] : memref<1x64xf32, #tpu.memory_space<vmem>>, vector<1x64xf32>
    %78 = vector.broadcast %77 : vector<1x64xf32> to vector<8x64xf32>
    %79 = arith.addf %76, %78 : vector<8x64xf32>
    %80 = arith.addf %1, %79 : vector<8x64xf32>
    %c0_31 = arith.constant 0 : index
    %c0_32 = arith.constant 0 : index
    %81 = vector.load %arg6[%c0_31, %c0_32] : memref<1x64xf32, #tpu.memory_space<vmem>>, vector<1x64xf32>
    %c0_33 = arith.constant 0 : index
    %c0_34 = arith.constant 0 : index
    %82 = vector.load %arg7[%c0_33, %c0_34] : memref<1x64xf32, #tpu.memory_space<vmem>>, vector<1x64xf32>
    %cst_35 = arith.constant dense<0.000000e+00> : vector<8xf32>
    %83 = vector.multi_reduction <add>, %80, %cst_35 [1] : vector<8x64xf32> to vector<8xf32>
    %84 = vector.shape_cast %83 : vector<8xf32> to vector<8x1xf32>
    %cst_36 = arith.constant 6.400000e+01 : f32
    %85 = vector.broadcast %cst_36 : f32 to vector<8x1xf32>
    %86 = arith.divf %84, %85 : vector<8x1xf32>
    %87 = vector.broadcast %86 : vector<8x1xf32> to vector<8x64xf32>
    %88 = arith.subf %80, %87 : vector<8x64xf32>
    %89 = arith.mulf %88, %88 : vector<8x64xf32>
    %cst_37 = arith.constant dense<0.000000e+00> : vector<8xf32>
    %90 = vector.multi_reduction <add>, %89, %cst_37 [1] : vector<8x64xf32> to vector<8xf32>
    %91 = vector.shape_cast %90 : vector<8xf32> to vector<8x1xf32>
    %cst_38 = arith.constant 6.400000e+01 : f32
    %92 = vector.broadcast %cst_38 : f32 to vector<8x1xf32>
    %93 = arith.divf %91, %92 : vector<8x1xf32>
    %94 = vector.broadcast %86 : vector<8x1xf32> to vector<8x64xf32>
    %95 = arith.subf %80, %94 : vector<8x64xf32>
    %cst_39 = arith.constant 9.99999974E-6 : f32
    %96 = vector.broadcast %cst_39 : f32 to vector<8x1xf32>
    %97 = arith.addf %93, %96 : vector<8x1xf32>
    %98 = math.rsqrt %97 : vector<8x1xf32>
    %99 = vector.broadcast %98 : vector<8x1xf32> to vector<8x64xf32>
    %100 = arith.mulf %95, %99 : vector<8x64xf32>
    %101 = vector.broadcast %81 : vector<1x64xf32> to vector<8x64xf32>
    %102 = arith.mulf %100, %101 : vector<8x64xf32>
    %103 = vector.broadcast %82 : vector<1x64xf32> to vector<8x64xf32>
    %104 = arith.addf %102, %103 : vector<8x64xf32>
    %c0_40 = arith.constant 0 : index
    %c0_41 = arith.constant 0 : index
    %105 = vector.load %arg8[%c0_40, %c0_41] : memref<64x128xf32, #tpu.memory_space<vmem>>, vector<64x128xf32>
    %cst_42 = arith.constant dense<0.000000e+00> : vector<8x128xf32>
    %106 = tpu.matmul %104, %105, %cst_42 {dimension_numbers = #tpu.dot_dimension_numbers<[1], [0], [0], [1], [0, 0, 1, 1], [], []>} : vector<8x64xf32>, vector<64x128xf32>, vector<8x128xf32> -> vector<8x128xf32>
    %c0_43 = arith.constant 0 : index
    %c0_44 = arith.constant 0 : index
    %107 = vector.load %arg9[%c0_43, %c0_44] : memref<1x128xf32, #tpu.memory_space<vmem>>, vector<1x128xf32>
    %108 = vector.broadcast %107 : vector<1x128xf32> to vector<8x128xf32>
    %109 = arith.addf %106, %108 : vector<8x128xf32>
    %cst_45 = arith.constant 0.000000e+00 : f32
    %110 = vector.broadcast %cst_45 : f32 to vector<8x128xf32>
    %111 = arith.maximumf %109, %110 : vector<8x128xf32>
    %c0_46 = arith.constant 0 : index
    %c0_47 = arith.constant 0 : index
    %112 = vector.load %arg10[%c0_46, %c0_47] : memref<128x64xf32, #tpu.memory_space<vmem>>, vector<128x64xf32>
    %cst_48 = arith.constant dense<0.000000e+00> : vector<8x64xf32>
    %113 = tpu.matmul %111, %112, %cst_48 {dimension_numbers = #tpu.dot_dimension_numbers<[1], [0], [0], [1], [0, 0, 1, 1], [], []>} : vector<8x128xf32>, vector<128x64xf32>, vector<8x64xf32> -> vector<8x64xf32>
    %c0_49 = arith.constant 0 : index
    %c0_50 = arith.constant 0 : index
    %114 = vector.load %arg11[%c0_49, %c0_50] : memref<1x64xf32, #tpu.memory_space<vmem>>, vector<1x64xf32>
    %115 = vector.broadcast %114 : vector<1x64xf32> to vector<8x64xf32>
    %116 = arith.addf %113, %115 : vector<8x64xf32>
    %117 = arith.addf %104, %116 : vector<8x64xf32>
    %c0_51 = arith.constant 0 : index
    %c0_52 = arith.constant 0 : index
    %118 = vector.load %arg12[%c0_51, %c0_52] : memref<1x64xf32, #tpu.memory_space<vmem>>, vector<1x64xf32>
    %c0_53 = arith.constant 0 : index
    %c0_54 = arith.constant 0 : index
    %119 = vector.load %arg13[%c0_53, %c0_54] : memref<1x64xf32, #tpu.memory_space<vmem>>, vector<1x64xf32>
    %cst_55 = arith.constant dense<0.000000e+00> : vector<8xf32>
    %120 = vector.multi_reduction <add>, %117, %cst_55 [1] : vector<8x64xf32> to vector<8xf32>
    %121 = vector.shape_cast %120 : vector<8xf32> to vector<8x1xf32>
    %cst_56 = arith.constant 6.400000e+01 : f32
    %122 = vector.broadcast %cst_56 : f32 to vector<8x1xf32>
    %123 = arith.divf %121, %122 : vector<8x1xf32>
    %124 = vector.broadcast %123 : vector<8x1xf32> to vector<8x64xf32>
    %125 = arith.subf %117, %124 : vector<8x64xf32>
    %126 = arith.mulf %125, %125 : vector<8x64xf32>
    %cst_57 = arith.constant dense<0.000000e+00> : vector<8xf32>
    %127 = vector.multi_reduction <add>, %126, %cst_57 [1] : vector<8x64xf32> to vector<8xf32>
    %128 = vector.shape_cast %127 : vector<8xf32> to vector<8x1xf32>
    %cst_58 = arith.constant 6.400000e+01 : f32
    %129 = vector.broadcast %cst_58 : f32 to vector<8x1xf32>
    %130 = arith.divf %128, %129 : vector<8x1xf32>
    %131 = vector.broadcast %123 : vector<8x1xf32> to vector<8x64xf32>
    %132 = arith.subf %117, %131 : vector<8x64xf32>
    %cst_59 = arith.constant 9.99999974E-6 : f32
    %133 = vector.broadcast %cst_59 : f32 to vector<8x1xf32>
    %134 = arith.addf %130, %133 : vector<8x1xf32>
    %135 = math.rsqrt %134 : vector<8x1xf32>
    %136 = vector.broadcast %135 : vector<8x1xf32> to vector<8x64xf32>
    %137 = arith.mulf %132, %136 : vector<8x64xf32>
    %138 = vector.broadcast %118 : vector<1x64xf32> to vector<8x64xf32>
    %139 = arith.mulf %137, %138 : vector<8x64xf32>
    %140 = vector.broadcast %119 : vector<1x64xf32> to vector<8x64xf32>
    %141 = arith.addf %139, %140 : vector<8x64xf32>
    %c0_60 = arith.constant 0 : index
    %c0_61 = arith.constant 0 : index
    %c0_62 = arith.constant 0 : index
    %142 = vector.load %arg14[%c0_60, %c0_61, %c0_62] : memref<1x8x64xf32, #tpu.memory_space<vmem>>, vector<1x8x64xf32>
    %143 = vector.shape_cast %142 : vector<1x8x64xf32> to vector<8x64xf32>
    %144 = vector.shape_cast %141 : vector<8x64xf32> to vector<1x8x64xf32>
    tpu.vector_store %arg14[%c0_60, %c0_61, %c0_62], %144 {strides = array<i32>} : memref<1x8x64xf32, #tpu.memory_space<vmem>>, vector<1x8x64xf32>,
    return
  }
  func.func @transform_0(%arg0: i32) -> (i32, i32, i32) {
    %c0_i32 = arith.constant 0 : i32
    %c0_i32_0 = arith.constant 0 : i32
    %c0_i32_1 = arith.constant 0 : i32
    return %arg0, %c0_i32, %c0_i32_0 : i32, i32, i32
  }
  func.func @transform_1(%arg0: i32) -> (i32, i32) {
    %c0_i32 = arith.constant 0 : i32
    %c0_i32_0 = arith.constant 0 : i32
    %c0_i32_1 = arith.constant 0 : i32
    return %c0_i32, %c0_i32_0 : i32, i32
  }
  func.func @transform_2(%arg0: i32) -> (i32, i32) {
    %c0_i32 = arith.constant 0 : i32
    %c0_i32_0 = arith.constant 0 : i32
    %c0_i32_1 = arith.constant 0 : i32
    return %c0_i32, %c0_i32_0 : i32, i32
  }
  func.func @transform_3(%arg0: i32) -> (i32, i32) {
    %c0_i32 = arith.constant 0 : i32
    %c0_i32_0 = arith.constant 0 : i32
    %c0_i32_1 = arith.constant 0 : i32
    return %c0_i32, %c0_i32_0 : i32, i32
  }
  func.func @transform_4(%arg0: i32) -> (i32, i32) {
    %c0_i32 = arith.constant 0 : i32
    %c0_i32_0 = arith.constant 0 : i32
    %c0_i32_1 = arith.constant 0 : i32
    return %c0_i32, %c0_i32_0 : i32, i32
  }
  func.func @transform_5(%arg0: i32) -> (i32, i32) {
    %c0_i32 = arith.constant 0 : i32
    %c0_i32_0 = arith.constant 0 : i32
    %c0_i32_1 = arith.constant 0 : i32
    return %c0_i32, %c0_i32_0 : i32, i32
  }
  func.func @transform_6(%arg0: i32) -> (i32, i32) {
    %c0_i32 = arith.constant 0 : i32
    %c0_i32_0 = arith.constant 0 : i32
    %c0_i32_1 = arith.constant 0 : i32
    return %c0_i32, %c0_i32_0 : i32, i32
  }
  func.func @transform_7(%arg0: i32) -> (i32, i32) {
    %c0_i32 = arith.constant 0 : i32
    %c0_i32_0 = arith.constant 0 : i32
    %c0_i32_1 = arith.constant 0 : i32
    return %c0_i32, %c0_i32_0 : i32, i32
  }
  func.func @transform_8(%arg0: i32) -> (i32, i32) {
    %c0_i32 = arith.constant 0 : i32
    %c0_i32_0 = arith.constant 0 : i32
    %c0_i32_1 = arith.constant 0 : i32
    return %c0_i32, %c0_i32_0 : i32, i32
  }
  func.func @transform_9(%arg0: i32) -> (i32, i32) {
    %c0_i32 = arith.constant 0 : i32
    %c0_i32_0 = arith.constant 0 : i32
    %c0_i32_1 = arith.constant 0 : i32
    return %c0_i32, %c0_i32_0 : i32, i32
  }
  func.func @transform_10(%arg0: i32) -> (i32, i32) {
    %c0_i32 = arith.constant 0 : i32
    %c0_i32_0 = arith.constant 0 : i32
    %c0_i32_1 = arith.constant 0 : i32
    return %c0_i32, %c0_i32_0 : i32, i32
  }
  func.func @transform_11(%arg0: i32) -> (i32, i32) {
    %c0_i32 = arith.constant 0 : i32
    %c0_i32_0 = arith.constant 0 : i32
    %c0_i32_1 = arith.constant 0 : i32
    return %c0_i32, %c0_i32_0 : i32, i32
  }
  func.func @transform_12(%arg0: i32) -> (i32, i32) {
    %c0_i32 = arith.constant 0 : i32
    %c0_i32_0 = arith.constant 0 : i32
    %c0_i32_1 = arith.constant 0 : i32
    return %c0_i32, %c0_i32_0 : i32, i32
  }
  func.func @transform_13(%arg0: i32) -> (i32, i32, i32) {
    %c0_i32 = arith.constant 0 : i32
    %c0_i32_0 = arith.constant 0 : i32
    %c0_i32_1 = arith.constant 0 : i32
    return %arg0, %c0_i32, %c0_i32_0 : i32, i32, i32
  }
}

</mosaic_0001>

<bundles_post_ra>
// kernel: tpu_custom_call.1
= control target key start
LH: loop header
LB: loop body
LE: loop exit
PB: predicated region body
PF: predicated region fallthrough
CT: control target
= control target key end

     0   :  { %s2702_s0 = inlined_call_operand.hbm [shape: f32[2,8,64], index: 0, kind: input, shape index: {}]   ;;  %s2703_s1 = inlined_call_operand.vmem [shape: f32[64,192], index: 1, kind: input, shape index: {}]   ;;  %s2704_s2 = inlined_call_operand.vmem [shape: f32[1,192], index: 2, kind: input, shape index: {}]   ;;  %s2705_s3 = inlined_call_operand.vmem [shape: f32[64,64], index: 3, kind: input, shape index: {}]   ;;  %s2706_s4 = inlined_call_operand.vmem [shape: f32[1,64], index: 4, kind: input, shape index: {}]   ;;  %s2707_s5 = inlined_call_operand.vmem [shape: f32[1,64], index: 5, kind: input, shape index: {}]   ;;  %s2708_s6 = inlined_call_operand.vmem [shape: f32[1,64], index: 6, kind: input, shape index: {}]   ;;  %s2709_s7 = inlined_call_operand.hbm [shape: f32[64,128], index: 7, kind: input, shape index: {}]   ;;  %s2710_s8 = inlined_call_operand.vmem [shape: f32[1,128], index: 8, kind: input, shape index: {}]   ;;  %s2711_s9 = inlined_call_operand.vmem [shape: f32[128,64], index: 9, kind: input, shape index: {}]   ;;  %s2712_s10 = inlined_call_operand.vmem [shape: f32[1,64], index: 10, kind: input, shape index: {}]   ;;  %s2713_s11 = inlined_call_operand.vmem [shape: f32[1,64], index: 11, kind: input, shape index: {}]   ;;  %s2714_s12 = inlined_call_operand.vmem [shape: f32[1,64], index: 12, kind: input, shape index: {}]   ;;  %s2715_s13 = inlined_call_operand.hbm [shape: f32[2,8,64], index: 13, kind: output, shape index: {}]  }
   0x1   :  { %2724 = sst [smem:[#allocation14_spill]] %s2702_s0 }
   0x2   :  { %2725 = sst [smem:[#allocation15_spill]] %s2713_s11 }
   0x3   :  { %2726 = sst [smem:[#allocation16_spill]] %s2714_s12 }
   0x4   :  { %2727 = sst [smem:[#allocation17_spill]] %s2715_s13 }
   0x5   :  { %18 = vsyncpa [#allocation3], 0 }
   0x6   :  { %20 = vsyncpa [#allocation3 + $0x1], 0 }
   0x7   :  { %21 = vsyncpa [#allocation6], 0 }
   0x8   :  { %22 = vsyncpa [#allocation4], 0 }
   0x9   :  { %24 = vsyncpa [#allocation4 + $0x1], 0  ;;  %s2249_s25 = smov 0   ;;  %s2251_s26 = smov 0  }
   0xa   :  { %s2253_s27 = smov 0   ;;  %s2255_s28 = smov 0  }
   0xb LB: > { %2728 = sst [smem:[#allocation11_spill]] %s2150_s25  ;;  %s2270_s29 = sadd.s32 4294967295, %s2162_s28   ;;  %s2162_s28 = sphi %s2255_s28, %s2750_s28   ;;  %s2158_s27 = sphi %s2253_s27, %s2753_s27   ;;  %s2154_s26 = sphi %s2251_s26, %s2752_s26   ;;  %s2150_s25 = sphi %s2249_s25, %s2751_s25  }
   0xc   : > { %s1681_s30 = sadd.s32 4294967294, %s2162_s28   ;;  %p50_p0 = scmp.ne.s32.totalorder %s2154_s26, %s2150_s25 }
   0xd   : > { %p2721_p1 = scmp.eq.s32.totalorder %s2270_s29, 0  ;;  %p332_p3 = scmp.eq.s32.totalorder %s1681_s30, 1 }
   0xe   : > { %p1682_p5 = scmp.ge.s32.totalorder %s2162_s28, 1  ;;  %p339_p7 = scmp.lt.s32.totalorder %s2162_s28, 3 }
   0xf   : > { %p2279_p4 = por %p2721_p1, %p50_p0  ;;  %p2284_p6 = por %p332_p3, %p50_p0 }
  0x10   : > { %p2289_p8 = pnand %p1682_p5, %p339_p7  ;;  %s2164_s17 = smov [#allocation5]  }
  0x11   : > { %s2729_s14 = scalar_select %p2279_p4, 1, 0 }
  0x12   : > { %s2730_s15 = scalar_select %p2284_p6, 1, 0 }
  0x13   : > { %s2732_s16 = scalar_select %p2289_p8, 1, 0 }
  0x14   : > { %2731 = sst [smem:[#allocation12_spill]] %s2730_s15  ;;  %s369_s18 = sshll.u32 %s2164_s17, 4  ;;  %s2293_s18 = int_to_ptr.vmem [resolvable:$true] %s369_s18 }
  0x15   : > { %p1953_p9 = pneg %p2289_p8  ;;  %s2305_s20 = sadd.s32 1, %s2162_s28  }
  0x16   : > { %2734 = sst [smem:[#allocation13_spill]] %s2305_s20  ;;  %s37_s21 = sadd.s32 1, %s2158_s27 }
  0x17   : > { %p2300_p11 = pnand %p1953_p9, %p2721_p1  ;;  %s34_s22 = ssub.s32 %s2162_s28, %s2305_s20 }
  0x18   : > { %s2034_s30 = scalar_lea.hbm %s2709_s7, 1024 }
  0x19   : > { %p2035_p12 = scmp.ne.s32.totalorder %s2709_s7, %s2034_s30  ;;  %p2036_p13 = pneg %p2300_p11 }
  0x1a   : > { %p2041_p5 = scmp.lt.u32.totalorder %s2034_s30, %s2709_s7 }
  0x1b   : > { %p2037_p0 = pnand %p2036_p13, %p2035_p12 }
  0x1d   : > { %p2038_p3 = pneg %p2037_p0 }
  0x1f   : > { %p2043_p7 = pnand %p2041_p5, %p2038_p3 }
  0x21   : > { %2046 = shalt.err (!%p2043_p7)
}
  0x22   : > { %s2047_s20 = scalar_lea.vmem %s2293_s18, 1024  ;;  %p2055_p2 = scmp.lt.s32.totalorder %s2293_s18, %s2293_s18 }
  0x23   : > { %p2048_p9 = scmp.ne.s32.totalorder %s2293_s18, %s2047_s20  ;;  %p2056_p6 = scmp.lt.s32.totalorder %s2047_s20, %s2047_s20 }
  0x25   : > { %p2050_p10 = pnand %p2048_p9, %p2036_p13  ;;  %p2057_p4 = por %p2056_p6, %p2055_p2 }
  0x27   : > { %p2051_p1 = pneg %p2050_p10 }
  0x29   : > { %p2058_p8 = pnand %p2057_p4, %p2051_p1 }
  0x2b   : > { %2061 = shalt.err (!%p2058_p8)
}
  0x2c   : > { %s2165_s15 = smov 128   ;;  %s2166_s13 = smov 8  }
  0x2d   : > { %1956 = dma.hbm_to_vmem [thread:$0]  (!%p2300_p11), %s2709_s7, 1024, %s2293_s18, [#allocation6], %s2165_s15, %s2165_s15, %s2166_s13  }
  0x2e   : > { %p35_p2 = scmp.eq.s32.totalorder %s34_s22, 0  ;;  %p44_p1 = scmp.ne.s32.totalorder %s2158_s27, %s2154_s26 }
  0x2f   : > { %p45_p4 = scmp.eq.s32.totalorder %s2162_s28, 0  ;;  %p1966_p6 = scmp.lt.s32.totalorder %s2162_s28, 2 }
  0x30   : > { %s2336_s20 = scalar_select %p35_p2, %s2158_s27, %s37_s21  }
  0x31   : > { %p46_p8 = por %p45_p4, %p44_p1  ;;  %p2735_p10 = scmp.eq.s32.totalorder %s2270_s29, 1 }
  0x32   : > { %s398_s30 = sand.u32 1, %s2158_s27   ;;  %s1686_s17 = sshll.u32 %s2162_s28, 7 }
  0x33   : > { %p2340_p12 = por %p2735_p10, %p44_p1  ;;  %s1685_s12 = sshll.u32 %s398_s30, 3 }
  0x34   : > { %s2737_s0 = sld [smem:[#allocation14_spill]]  ;;  %s402_s18 = scalar_lea.vmem [#allocation2], %s1685_s12 }
  0x35   : > { %s409_s21 = sshll.u32 %s402_s18, 4  ;;  %p2351_p11 = pnand %p1966_p6, %p46_p8  ;;  %s2355_s21 = int_to_ptr.vmem [resolvable:$true] %s409_s21 }
  0x36   : > { %s399_s15 = scalar_lea.sflag [#allocation3], %s398_s30 }
  0x37   : > { %p2064_p0 = pneg %p2351_p11 }
  0x3a   : > { %s2349_s25 = scalar_lea.hbm %s2737_s0, %s1686_s17  ;;  %s2067_s23 = scalar_lea.hbm %s2737_s0, 256 }
  0x3b   : > { %s2062_s13 = scalar_lea.hbm %s2349_s25, 128  ;;  %p2068_p7 = scmp.lt.u32.totalorder %s2349_s25, %s2737_s0 }
  0x3c   : > { %p2063_p13 = scmp.ne.s32.totalorder %s2349_s25, %s2062_s13  ;;  %p2069_p9 = scmp.lt.u32.totalorder %s2067_s23, %s2062_s13 }
  0x3d   : > { %p2071_p1 = scmp.lt.u32.totalorder %s2062_s13, %s2349_s25 }
  0x3e   : > { %p2065_p3 = pnand %p2064_p0, %p2063_p13  ;;  %p2070_p2 = por %p2069_p9, %p2068_p7 }
  0x40   : > { %p2066_p5 = pneg %p2065_p3  ;;  %p2072_p4 = por %p2071_p1, %p2070_p2 }
  0x42   : > { %p2073_p6 = pnand %p2072_p4, %p2066_p5 }
  0x44   : > { %2076 = shalt.err (!%p2073_p6)
}
  0x45   : > { %s2077_s30 = scalar_lea.vmem %s2355_s21, 128  ;;  %s2167_s18 = smov [#allocation2]  }
  0x46   : > { %p2078_p8 = scmp.ne.s32.totalorder %s2355_s21, %s2077_s30  ;;  %s2082_s11 = sshll.u32 %s2167_s18, 4  ;;  %s2083_s11 = int_to_ptr.vmem [resolvable:$false] %s2082_s11 }
  0x47   : > { %s2084_s12 = scalar_lea.vmem %s2083_s11, 256  ;;  %p2085_p3 = scmp.lt.s32.totalorder %s2355_s21, %s2083_s11 }
  0x48   : > { %p2080_p10 = pnand %p2078_p8, %p2064_p0  ;;  %p2086_p7 = scmp.lt.s32.totalorder %s2084_s12, %s2077_s30 }
  0x4a   : > { %p2081_p13 = pneg %p2080_p10  ;;  %p2087_p9 = por %p2086_p7, %p2085_p3 }
  0x4c   : > { %p2088_p2 = pnand %p2087_p9, %p2081_p13 }
  0x4e   : > { %2091 = shalt.err (!%p2088_p2)
}
  0x4f   : > { %1960 = dma.hbm_to_vmem [thread:$0]  (!%p2351_p11), %s2349_s25, 128, %s2355_s21, %s399_s15  }
  0x50   : > { %p2739_p5 = scmp.ne.s32.totalorder %s2732_s16, 0 }
  0x51   : > { %s2385_s13 = sand.u32 (!%p2739_p5), 1, %s2154_s26   ;;  %p2740_p0 = scmp.ne.s32.totalorder (!%p2739_p5), %s2729_s14, 0 }
  0x52   : > { %418 = sbr.rel (%p2739_p5) target bundleno = 3185 (0xc71), region = 72  ;;  %s1688_s23 = sshll.u32 (!%p2739_p5), %s2385_s13, 3 }
  0x53   : > { %s421_s17 = scalar_lea.sflag (!%p2739_p5), [#allocation3], %s2385_s13  ;;  %s2391_s19 = scalar_lea.vmem (!%p2739_p5), [#allocation2], %s1688_s23 }
  0x59   : > { %2137 = dma.done.wait (%p2740_p0), %s421_s17, 128  }
  0x5a   : > { %2139 = vsyncadd (%p2740_p0), %s421_s17, 4294967168  ;;  %p2741_p11 = scmp.eq.s32.totalorder %s2270_s29, 0 }
  0x5c   : > { %2141 = dma.done.wait (%p2741_p11), [#allocation6], 1024   ;;  %p2742_p1 = pmov %p2741_p11 }
  0x5d   : > { %v2168_v0 = vmov 0.0   ;;  %v473_v1 = vld [vmem:[%s2703_s1 + $0x8] sm:$0xff]  ;;  %v475_v2 = vld [vmem:[%s2703_s1 + $0x18] sm:$0xff]  ;;  %v472_v3 = vld [vmem:[%s2703_s1] sm:$0xff]  ;;  %vm500_vm0 = vcmask 523264   ;;  %v490_v26 = vlaneseq  ;;  %vm2169_vm1 = vmmov 0  }
  0x5e   : > { %2143 = vsyncadd (%p2742_p1), [#allocation6], 4294966272  ;;  %568 = vmatprep.mubr.f32.mxu1 %v2168_v0  ;;  %1788 = vmatprep.subr.mxu0 %v2168_v0  ;;  %v1881_v4 = vpack.c.bf16 %v475_v2, %v473_v1  ;;  %v474_v5 = vld [vmem:[%s2703_s1 + $0x10] sm:$0xff]  ;;  %v477_v6 = vld [vmem:[%s2703_s1 + $0x28] sm:$0xff]  ;;  %s2171_s25 = smov 64   ;;  %s2172_s21 = smov 112  }
  0x5f   : > { %v479_v7 = vld [vmem:[%s2703_s1 + $0x38] sm:$0xff]  ;;  %v1883_v8 = vpack.c.bf16 %v474_v5, %v472_v3  ;;  %v476_v10 = vld [vmem:[%s2703_s1 + $0x20] sm:$0xff]  ;;  %v478_v11 = vld [vmem:[%s2703_s1 + $0x30] sm:$0xff]  ;;  %v491_v27 = vshrl.u32 %v490_v26, 7  ;;  %1790 = vmatprep.mubr.msk.f32.mxu0 %vm2169_vm1, %v2168_v0  ;;  %s2173_s22 = smov 32   ;;  %s2174_s14 = smov 96  }
  0x60   : > { %v1885_v9 = vpack.c.bf16 %v479_v7, %v477_v6  ;;  %v481_v12 = vld [vmem:[%s2703_s1 + $0x48] sm:$0xff]  ;;  %1882 = vmatprep.subr.bf16.mxu1 %v1881_v4  ;;  %v483_v13 = vld [vmem:[%s2703_s1 + $0x58] sm:$0xff]  ;;  %v1887_v14 = vpack.c.bf16 %v478_v11, %v476_v10  ;;  %v480_v16 = vld [vmem:[%s2703_s1 + $0x40] sm:$0xff]  ;;  %vm578_vm2 = vcmask 130048   ;;  %vm654_vm3 = vcmask 64512   ;;  %s2175_s15 = smov 80  }
  0x61   : > { %1884 = vmatpush1.bf16.msra.mxu1 %v1883_v8  ;;  %v1889_v15 = vpack.c.bf16 %v483_v13, %v481_v12  ;;  %v482_v17 = vld [vmem:[%s2703_s1 + $0x50] sm:$0xff]  ;;  %v485_v18 = vld [vmem:[%s2703_s1 + $0x68] sm:$0xff]  ;;  %v487_v19 = vld [vmem:[%s2703_s1 + $0x78] sm:$0xff]  ;;  %v492_v28 = vsub.s32 0, %v491_v27  ;;  %v496_v34 = vsub.s32 1, %v491_v27  ;;  %s2176_s30 = smov 16  }
  0x62   : > { %1886 = vmatprep.subr.bf16.mxu1 %v1885_v9  ;;  %v1891_v20 = vpack.c.bf16 %v482_v17, %v480_v16  ;;  %v1893_v21 = vpack.c.bf16 %v487_v19, %v485_v18  ;;  %v484_v22 = vld [vmem:[%s2703_s1 + $0x60] sm:$0xff]  ;;  %v486_v23 = vld [vmem:[%s2703_s1 + $0x70] sm:$0xff]  ;;  %vm1251_vm4 = vcmask 261120   ;;  %vm1253_vm5 = vcmask 392192   ;;  %s2743_s17 = sld [smem:[#allocation15_spill]]  ;;  %s2745_s18 = sld [smem:[#allocation17_spill]] }
  0x63   : > { %v1895_v24 = vpack.c.bf16 %v486_v23, %v484_v22  ;;  %v2452_v25 = vld [vmem:[%s2391_s19] sm:$0xff]  ;;  %s2170_s19 = smov 48   ;;  %s1588_s11 = scalar_lea.sflag [#allocation4], %s2385_s13 }
  0x64   : > { %v488_v29 = vld [vmem:[%s2704_s2] sm:$0x3] }
  0x65   : > { %1888 = vmatpush1.bf16.msra.mxu1 %v1887_v14  ;;  %v493_v30 = vrot.slane %v488_v29, %v492_v28  ;;  %v497_v35 = vrot.slane %v488_v29, %v496_v34 }
  0x66   : > { %1890 = vmatprep.subr.bf16.mxu1 %v1889_v15 }
  0x69   : > { %1892 = vmatpush1.bf16.msra.mxu1 %v1891_v20 }
  0x6a   : > { %1894 = vmatprep.subr.bf16.mxu1 %v1893_v21 }
  0x6d   : > { %1896 = vmatpush1.bf16.msra.mxu1 %v1895_v24 }
  0x6e   : > { %1768 = vmatprep.subr.mxu1 %v2168_v0 }
  0x70   : > { %1691 = vmatmul.mubr.msk.f32.vlgmr.msra.gmra.mrb[0].mxu1 %vm500_vm0, %v2452_v25 }
  0x71   : > { %1770 = vmatprep.mubr.msk.f32.mxu1 %vm2169_vm1, %v2168_v0 }
 0x143   : > { %v570_v31 = vpop.f32.mrb[0].mxu1 }
 0x144   : > { %v571_v32 = vadd.f32 %v570_v31, %v493_v30  ;;  %v572_v33 = vpop.f32.mrb[1].mxu1 }
 0x145   : > { %v2470_v38 = vadd.f32 %v572_v33, %v497_v35  ;;  %v1255_v35 = vld [vmem:[%s2705_s3] sm:$0xff] }
 0x146   : > { %741 = vrot.lane.b32.xlu1 %v571_v32, %s2170_s19  ;;  %576 = vrot.lane.b32.xlu0 %v571_v32, %s2171_s25 }
 0x14a   : > { %739 = vrot.lane.b32.xlu1 %v571_v32, %s2172_s21 }
 0x14e   : > { %908 = vrot.lane.b32.xlu1 %v571_v32, %s2173_s22 }
 0x152   : > { %906 = vrot.lane.b32.xlu1 %v571_v32, %s2174_s14 }
 0x1b8   : > { %v742_v36 = vpop.permute.xlu1 %741  ;;  %v577_v37 = vpop.permute.xlu0 %576 }
 0x1b9   : > { %1769 = vmatpush3.xpose.msk.msra.mxu1 %vm578_vm2, %v577_v37  ;;  %v1257_v37 = vld [vmem:[%s2705_s3 + $0x10] sm:$0xff] }
 0x1ba   : > { %1773 = vmatprep.subr.mxu1 %v2168_v0 }
 0x1bc   : > { %v740_v39 = vpop.permute.xlu1 %739  ;;  %1771 = vmatmul.mubr.msk.f32.vlgmr.msra.gmra.mrb[2].mxu1 %vm578_vm2, %v571_v32 }
 0x1bd   : > { %1774 = vmatpush3.msra.mxu1 %v2470_v38  ;;  %1775 = vmatprep.mubr.msk.f32.mxu1 %vm2169_vm1, %v2168_v0 }
 0x1be   : > { %1778 = vmatprep.subr.mxu1 %v2168_v0 }
 0x1c0   : > { %v909_v40 = vpop.permute.xlu1 %908 }
 0x1c1   : > { %1789 = vmatpush3.xpose.msk.msra.mxu0 %vm578_vm2, %v909_v40  ;;  %v1258_v40 = vld [vmem:[%s2705_s3 + $0x18] sm:$0xff] }
 0x1c2   : > { %1798 = vmatprep.subr.mxu0 %v2168_v0 }
 0x1c4   : > { %v907_v41 = vpop.permute.xlu1 %906 }
 0x1c5   : > { %1791 = vmatmul.mubr.msk.f32.vlgmr.msra.gmra.mrb[0].mxu0 %vm578_vm2, %v907_v41  ;;  %v1901_v41 = vpack.c.bf16 %v1258_v40, %v1257_v37  ;;  %v1475_v37 = vld [vmem:[%s2711_s9 + $0x60] sm:$0xff] }
 0x1c6   : > { %1800 = vmatprep.mubr.msk.f32.mxu0 %vm2169_vm1, %v2168_v0 }
 0x28f   : > { %v649_v42 = vpop.f32.mrb[2].mxu1 }
 0x290   : > { %v653_v43 = vmul.f32 0.25, %v649_v42  ;;  %v1772_v44 = vpop.f32.mrb[3].mxu1  ;;  %v1259_v42 = vld [vmem:[%s2705_s3 + $0x20] sm:$0xff] }
 0x292   : > { %v655_v45 = vsel %vm654_vm3, %v653_v43, -inf }
 0x293   : > { %656 = vmax.xlane.f32.xlu0 %v655_v45  ;;  %v1261_v45 = vld [vmem:[%s2705_s3 + $0x30] sm:$0xff] }
 0x298   : > { %v980_v46 = vpop.f32.mrb[0].mxu0 }
 0x299   : > { %v1792_v47 = vpop.f32.mrb[1].mxu0  ;;  %v984_v48 = vmul.f32 0.25, %v980_v46  ;;  %v1262_v46 = vld [vmem:[%s2705_s3 + $0x38] sm:$0xff] }
 0x29a   : > { %v1907_v47 = vpack.c.bf16 %v1262_v46, %v1261_v45  ;;  %v1706_v45 = vld [vmem:[%s2707_s5] ss:$0 sm:$0xff] }
 0x29b   : > { %v985_v49 = vsel %vm654_vm3, %v984_v48, -inf }
 0x2a9   : > { %1072 = vrot.lane.b32.xlu0 %v571_v32, %s2175_s15 }
 0x2c8   : > { %986 = vmax.xlane.f32.xlu0 %v985_v49 }
 0x2de   : > { %830 = vrot.lane.b32.xlu0 %v2470_v38, %s2172_s21  ;;  %s2744_s21 = sld [smem:[#allocation16_spill]] }
 0x320   : > { %v657_v50 = vpop.xlane.xlu0 %656 }
 0x321   : > { %v658_v51 = vsub.f32 %v653_v43, %v657_v50  ;;  %v1260_v43 = vld [vmem:[%s2705_s3 + $0x28] sm:$0xff] }
 0x322   : > { %v1904_v44 = vpack.c.bf16 %v1260_v43, %v1259_v42 }
 0x323   : > { %v659_v52 = vmul.f32 1.442695, %v658_v51 }
 0x324   : > { %v1073_v57 = vpop.permute.xlu0 %1072 }
 0x325   : > { %2014 = vpow2.f32 %v659_v52 }
 0x32f   : > { %v2015_v53 = vpop.eup %2014 }
 0x330   : > { %v661_v54 = vsel %vm654_vm3, %v2015_v53, 0.0 }
 0x331   : > { %662 = vadd.xlane.f32.xlu1 %v661_v54 }
 0x342   : > { %1074 = vrot.lane.b32.xlu1 %v571_v32, %s2176_s30 }
 0x355   : > { %v987_v59 = vpop.xlane.xlu0 %986 }
 0x356   : > { %v988_v62 = vsub.f32 %v984_v48, %v987_v59 }
 0x358   : > { %v989_v2 = vmul.f32 1.442695, %v988_v62 }
 0x359   : > { %v831_v61 = vpop.permute.xlu0 %830 }
 0x3be   : > { %v663_v55 = vpop.xlane.xlu1 %662 }
 0x3bf   : > { %2016 = vrcp.f32 %v663_v55 }
 0x3c0   : > { %2018 = vpow2.f32 %v989_v2 }
 0x3c2   : > { %v1075_v56 = vpop.permute.xlu1 %1074 }
 0x3c3   : > { %1799 = vmatpush3.xpose.msk.msra.mxu0 %vm578_vm2, %v1075_v56 }
 0x3c6   : > { %1801 = vmatmul.mubr.msk.f32.vlgmr.msra.gmra.mrb[2].mxu0 %vm578_vm2, %v1073_v57 }
 0x3c7   : > { %1824 = vmatprep.mubr.msk.f32.mxu0 %vm2169_vm1, %v2168_v0 }
 0x3c9   : > { %v2017_v58 = vpop.eup %2016 }
 0x3ca   : > { %v665_v60 = vmul.f32 %v2017_v58, %v2015_v53  ;;  %v2019_v11 = vpop.eup %2018 }
 0x3cb   : > { %v991_v12 = vsel %vm654_vm3, %v2019_v11, 0.0 }
 0x3cc   : > { %1776 = vmatmul.mubr.msk.f32.vlgmr.msra.gmra.mrb[4].mxu1 %vm654_vm3, %v665_v60  ;;  %v1704_v60 = vld [vmem:[%s2706_s4] ss:$0 sm:$0xff] }
 0x3cd   : > { %1779 = vmatpush3.xpose.msk.msra.mxu1 %vm578_vm2, %v742_v36  ;;  %1780 = vmatprep.mubr.msk.f32.mxu1 %vm2169_vm1, %v2168_v0  ;;  %v1256_v36 = vld [vmem:[%s2705_s3 + $0x8] sm:$0xff] }
 0x3ce   : > { %1783 = vmatprep.subr.mxu1 %v2168_v0 }
 0x3d0   : > { %1781 = vmatmul.mubr.msk.f32.vlgmr.msra.gmra.mrb[6].mxu1 %vm578_vm2, %v740_v39  ;;  %v1898_v39 = vpack.c.bf16 %v1256_v36, %v1255_v35  ;;  %v1474_v35 = vld [vmem:[%s2711_s9 + $0x58] sm:$0xff] }
 0x3d1   : > { %1784 = vmatpush3.msra.mxu1 %v831_v61  ;;  %1785 = vmatprep.mubr.msk.f32.mxu1 %vm2169_vm1, %v2168_v0 }
 0x3d2   : > { %1793 = vmatprep.subr.mxu1 %v2168_v0 }
 0x499   : > { %v1146_v63 = vpop.f32.mrb[2].mxu0 }
 0x49a   : > { %v1802_v1 = vpop.f32.mrb[3].mxu0  ;;  %v1150_v8 = vmul.f32 0.25, %v1146_v63 }
 0x49c   : > { %v1151_v10 = vsel %vm654_vm3, %v1150_v8, -inf }
 0x49f   : > { %v2502_v3 = vpop.f32.mrb[4].mxu1 }
 0x4a0   : > { %v1777_v4 = vpop.f32.mrb[5].mxu1 }
 0x4a3   : > { %v813_v5 = vpop.f32.mrb[6].mxu1 }
 0x4a4   : > { %v817_v6 = vmul.f32 0.25, %v813_v5  ;;  %v1782_v7 = vpop.f32.mrb[7].mxu1 }
 0x4a5   : > { %v1374_v7 = vld [vmem:[#allocation5] sm:$0xff] }
 0x4a6   : > { %v818_v9 = vsel %vm654_vm3, %v817_v6, -inf }
 0x4a7   : > { %819 = vmax.xlane.f32.xlu1 %v818_v9 }
 0x4ab   : > { %1152 = vmax.xlane.f32.xlu1 %v1151_v10  ;;  %v1377_v10 = vld [vmem:[#allocation5 + $0x18] sm:$0xff] }
 0x4af   : > { %992 = vadd.xlane.f32.xlu1 %v991_v12  ;;  %v1378_v12 = vld [vmem:[#allocation5 + $0x20] sm:$0xff] }
 0x534   : > { %v820_v13 = vpop.xlane.xlu1 %819 }
 0x535   : > { %v821_v19 = vsub.f32 %v817_v6, %v820_v13  ;;  %v1379_v13 = vld [vmem:[#allocation5 + $0x28] sm:$0xff] }
 0x537   : > { %v822_v20 = vmul.f32 1.442695, %v821_v19  ;;  %v1464_v19 = vld [vmem:[%s2711_s9 + $0x8] sm:$0xff] }
 0x538   : > { %v1153_v14 = vpop.xlane.xlu1 %1152 }
 0x539   : > { %v1154_v15 = vsub.f32 %v1150_v8, %v1153_v14  ;;  %v1375_v8 = vld [vmem:[#allocation5 + $0x8] sm:$0xff]  ;;  %v1916_v14 = vpack.c.bf16 %v1379_v13, %v1378_v12 }
 0x53a   : > { %v1910_v9 = vpack.c.bf16 %v1375_v8, %v1374_v7  ;;  %v1711_v8 = vld [vmem:[%s2743_s17] ss:$0 sm:$0xff] }
 0x53b   : > { %v1155_v16 = vmul.f32 1.442695, %v1154_v15  ;;  %v1380_v15 = vld [vmem:[#allocation5 + $0x30] sm:$0xff] }
 0x53c   : > { %v993_v23 = vpop.xlane.xlu1 %992 }
 0x53d   : > { %2020 = vpow2.f32 %v1155_v16  ;;  %v1381_v16 = vld [vmem:[#allocation5 + $0x38] sm:$0xff] }
 0x53e   : > { %2022 = vpow2.f32 %v822_v20  ;;  %v1465_v20 = vld [vmem:[%s2711_s9 + $0x10] sm:$0xff] }
 0x547   : > { %v2021_v17 = vpop.eup %2020 }
 0x548   : > { %v1157_v18 = vsel %vm654_vm3, %v2021_v17, 0.0  ;;  %v2023_v21 = vpop.eup %2022 }
 0x549   : > { %1158 = vadd.xlane.f32.xlu1 %v1157_v18  ;;  %v824_v22 = vsel %vm654_vm3, %v2023_v21, 0.0  ;;  %v1463_v18 = vld [vmem:[%s2711_s9] sm:$0xff] }
 0x55a   : > { %996 = vrot.lane.b32.xlu1 %v2470_v38, %s2174_s14 }
 0x57e   : > { %825 = vadd.xlane.f32.xlu1 %v824_v22  ;;  %v1466_v22 = vld [vmem:[%s2711_s9 + $0x18] sm:$0xff] }
 0x58f   : > { %1162 = vrot.lane.b32.xlu1 %v2470_v38, %s2175_s15  ;;  %v2177_v38 = vmov 0.0|0.0  }
 0x590   : > { %1897 = vmatprep.subr.bf16.mxu0 %v2177_v38 }
 0x591   : > { %1899 = vmatpush3.bf16.msra.mxu0 %v1898_v39  ;;  %v1476_v39 = vld [vmem:[%s2711_s9 + $0x68] sm:$0xff] }
 0x592   : > { %1900 = vmatprep.subr.bf16.mxu0 %v2177_v38  ;;  %v1940_v40 = vpack.c.bf16 %v1476_v39, %v1475_v37 }
 0x595   : > { %1902 = vmatpush3.bf16.msra.mxu0 %v1901_v41 }
 0x596   : > { %1903 = vmatprep.subr.bf16.mxu0 %v2177_v38 }
 0x599   : > { %1905 = vmatpush3.bf16.msra.mxu0 %v1904_v44 }
 0x59a   : > { %1906 = vmatprep.subr.bf16.mxu0 %v2177_v38 }
 0x59d   : > { %1908 = vmatpush3.bf16.msra.mxu0 %v1907_v47  ;;  %v1707_v47 = vld [vmem:[%s2708_s6] ss:$0 sm:$0xff] }
 0x59e   : > { %1921 = vmatprep.subr.bf16.mxu0 %v2177_v38 }
 0x5d6   : > { %v1159_v24 = vpop.xlane.xlu1 %1158 }
 0x5da   : > { %v997_v26 = vpop.permute.xlu1 %996 }
 0x60b   : > { %v826_v27 = vpop.xlane.xlu1 %825 }
 0x60c   : > { %2024 = vrcp.f32 %v826_v27 }
 0x60d   : > { %2026 = vrcp.f32 %v993_v23  ;;  %v1925_v23 = vpack.c.bf16 %v1466_v22, %v1465_v20 }
 0x60e   : > { %2028 = vrcp.f32 %v1159_v24  ;;  %v1467_v24 = vld [vmem:[%s2711_s9 + $0x20] sm:$0xff] }
 0x60f   : > { %v1163_v33 = vpop.permute.xlu1 %1162 }
 0x616   : > { %v2025_v28 = vpop.eup %2024 }
 0x617   : > { %v828_v29 = vmul.f32 %v2025_v28, %v2023_v21  ;;  %v2027_v30 = vpop.eup %2026  ;;  %v1922_v21 = vpack.c.bf16 %v1464_v19, %v1463_v18  ;;  %v1469_v28 = vld [vmem:[%s2711_s9 + $0x30] sm:$0xff] }
 0x618   : > { %v995_v31 = vmul.f32 %v2027_v30, %v2019_v11  ;;  %v2029_v32 = vpop.eup %2028 }
 0x619   : > { %1786 = vmatmul.mubr.msk.f32.vlgmr.msra.gmra.mrb[8].mxu1 %vm654_vm3, %v828_v29  ;;  %v1161_v34 = vmul.f32 %v2029_v32, %v2021_v17  ;;  %v1919_v17 = vpack.c.bf16 %v1381_v16, %v1380_v15  ;;  %v1470_v29 = vld [vmem:[%s2711_s9 + $0x38] sm:$0xff]  ;;  %v1472_v32 = vld [vmem:[%s2711_s9 + $0x48] sm:$0xff] }
 0x61a   : > { %1794 = vmatpush3.msra.mxu1 %v997_v26  ;;  %1795 = vmatprep.mubr.msk.f32.mxu1 %vm2169_vm1, %v2168_v0  ;;  %v1468_v26 = vld [vmem:[%s2711_s9 + $0x28] sm:$0xff]  ;;  %v1931_v30 = vpack.c.bf16 %v1470_v29, %v1469_v28 }
 0x61b   : > { %1803 = vmatprep.subr.mxu1 %v2168_v0  ;;  %v1928_v27 = vpack.c.bf16 %v1468_v26, %v1467_v24 }
 0x61d   : > { %1796 = vmatmul.mubr.msk.f32.vlgmr.msra.gmra.mrb[10].mxu1 %vm654_vm3, %v995_v31  ;;  %v1471_v31 = vld [vmem:[%s2711_s9 + $0x40] sm:$0xff] }
 0x61e   : > { %1804 = vmatpush3.msra.mxu1 %v1163_v33  ;;  %1805 = vmatprep.mubr.msk.f32.mxu1 %vm2169_vm1, %v2168_v0  ;;  %v1934_v33 = vpack.c.bf16 %v1472_v32, %v1471_v31 }
 0x61f   : > { %1909 = vmatprep.subr.bf16.mxu1 %v2177_v38 }
 0x621   : > { %1806 = vmatmul.mubr.msk.f32.vlgmr.msra.gmra.mrb[12].mxu1 %vm654_vm3, %v1161_v34  ;;  %v1473_v34 = vld [vmem:[%s2711_s9 + $0x50] sm:$0xff] }
 0x622   : > { %1843 = vmatprep.mubr.msk.f32.mxu1 %vm2169_vm1, %v2168_v0  ;;  %1911 = vmatpush3.bf16.msra.mxu1 %v1910_v9  ;;  %v1937_v36 = vpack.c.bf16 %v1474_v35, %v1473_v34 }
 0x623   : > { %1912 = vmatprep.subr.bf16.mxu1 %v2177_v38 }
 0x6ec   : > { %v902_v48 = vpop.f32.mrb[8].mxu1 }
 0x6ed   : > { %1239 = vrot.lane.b32.xlu0 %v902_v48, %s2176_s30  ;;  %v1787_v49 = vpop.f32.mrb[9].mxu1  ;;  %s470_s30 = scalar_lea.vmem [#allocation7], %s1688_s23 }
 0x6f0   : > { %v1068_v50 = vpop.f32.mrb[10].mxu1 }
 0x6f1   : > { %1243 = vrot.lane.b32.xlu1 %v1068_v50, %s2173_s22  ;;  %v1797_v51 = vpop.f32.mrb[11].mxu1  ;;  %v1478_v50 = vld [vmem:[%s2711_s9 + $0x78] sm:$0xff]  ;;  %s1714_s22 = sshll.u32 %s2270_s29, 7  ;;  %s2178_s29 = smov [#allocation7]  }
 0x6f2   : > { %s2657_s0 = scalar_lea.hbm %s2745_s18, %s1714_s22  ;;  %s2096_s23 = sshll.u32 %s2178_s29, 4  ;;  %s2097_s23 = int_to_ptr.vmem [resolvable:$false] %s2096_s23 }
 0x6f3   : > { %s2098_s17 = scalar_lea.vmem %s2097_s23, 256 }
 0x6f4   : > { %v1234_v52 = vpop.f32.mrb[12].mxu1 }
 0x6f5   : > { %1247 = vrot.lane.b32.xlu0 %v1234_v52, %s2170_s19  ;;  %v1807_v53 = vpop.f32.mrb[13].mxu1  ;;  %v1708_v52 = vld [vmem:[%s2710_s8] ss:$0 sm:$0xff]  ;;  %s1601_s19 = sshll.u32 %s470_s30, 4  ;;  %s2659_s19 = int_to_ptr.vmem [resolvable:$true] %s1601_s19 }
 0x6f6   : > { %s2092_s12 = scalar_lea.vmem %s2659_s19, 128  ;;  %p2099_p10 = scmp.lt.s32.totalorder %s2659_s19, %s2097_s23 }
 0x6f7   : > { %p2093_p4 = scmp.ne.s32.totalorder %s2659_s19, %s2092_s12  ;;  %p2100_p13 = scmp.lt.s32.totalorder %s2098_s17, %s2092_s12 }
 0x6f9   : > { %p2094_p6 = pnand %p2093_p4, %p2340_p12  ;;  %p2101_p3 = por %p2100_p13, %p2099_p10 }
 0x6fb   : > { %p2095_p8 = pneg %p2094_p6 }
 0x6fd   : > { %p2102_p7 = pnand %p2101_p3, %p2095_p8 }
 0x75f   : > { %v1240_v54 = vpop.permute.xlu0 %1239 }
 0x760   : > { %v1250_v56 = vsel %vm578_vm2, %v2502_v3, %v1240_v54 }
 0x763   : > { %v1244_v55 = vpop.permute.xlu1 %1243 }
 0x764   : > { %v1252_v57 = vsel %vm1251_vm4, %v1250_v56, %v1244_v55 }
 0x767   : > { %v1248_v58 = vpop.permute.xlu0 %1247 }
 0x768   : > { %v1254_v59 = vsel %vm1253_vm5, %v1252_v57, %v1248_v58  ;;  %v1710_v57 = vld [vmem:[%s2712_s10] ss:$0 sm:$0xff] }
 0x769   : > { %1825 = vmatmul.mubr.msk.f32.vlgmr.msra.gmra.mrb[4].mxu0 %vm500_vm0, %v1254_v59 }
 0x76a   : > { %1878 = vmatprep.mubr.msk.f32.mxu0 %vm2169_vm1, %v2168_v0  ;;  %1923 = vmatpush3.bf16.msra.mxu0 %v1922_v21 }
 0x76b   : > { %1924 = vmatprep.subr.bf16.mxu0 %v2177_v38 }
 0x76e   : > { %1926 = vmatpush3.bf16.msra.mxu0 %v1925_v23 }
 0x76f   : > { %1927 = vmatprep.subr.bf16.mxu0 %v2177_v38 }
 0x772   : > { %1929 = vmatpush3.bf16.msra.mxu0 %v1928_v27 }
 0x773   : > { %1930 = vmatprep.subr.bf16.mxu0 %v2177_v38 }
 0x776   : > { %1932 = vmatpush3.bf16.msra.mxu0 %v1931_v30 }
 0x777   : > { %1933 = vmatprep.subr.bf16.mxu0 %v2177_v38 }
 0x77a   : > { %1935 = vmatpush3.bf16.msra.mxu0 %v1934_v33 }
 0x77b   : > { %1936 = vmatprep.subr.bf16.mxu0 %v2177_v38 }
 0x77e   : > { %1938 = vmatpush3.bf16.msra.mxu0 %v1937_v36 }
 0x77f   : > { %1939 = vmatprep.subr.bf16.mxu0 %v2177_v38 }
 0x782   : > { %1941 = vmatpush3.bf16.msra.mxu0 %v1940_v40 }
 0x783   : > { %1942 = vmatprep.subr.bf16.mxu0 %v2177_v38 }
 0x83c   : > { %v1339_v61 = vpop.f32.mrb[4].mxu0 }
 0x83d   : > { %v1340_v62 = vadd.f32 %v1704_v60, %v1339_v61  ;;  %v1826_v63 = vpop.f32.mrb[5].mxu0 }
 0x83f   : > { %v1343_v1 = vadd.f32 %v1340_v62, %v2452_v25  ;;  %v1376_v25 = vld [vmem:[#allocation5 + $0x10] sm:$0xff] }
 0x840   : > { %v1913_v11 = vpack.c.bf16 %v1377_v10, %v1376_v25  ;;  %v1712_v25 = vld [vmem:[%s2744_s21] ss:$0 sm:$0xff] }
 0x841   : > { %v1346_v2 = vsel %vm500_vm0, %v1343_v1, 0.0 }
 0x842   : > { %1347 = vadd.xlane.f32.xlu1 %v1346_v2  ;;  %1914 = vmatpush3.bf16.msra.mxu1 %v1913_v11 }
 0x843   : > { %1915 = vmatprep.subr.bf16.mxu1 %v2177_v38 }
 0x846   : > { %1917 = vmatpush3.bf16.msra.mxu1 %v1916_v14 }
 0x847   : > { %1918 = vmatprep.subr.bf16.mxu1 %v2177_v38  ;;  %v1477_v38 = vld [vmem:[%s2711_s9 + $0x70] sm:$0xff] }
 0x848   : > { %v1943_v51 = vpack.c.bf16 %v1478_v50, %v1477_v38 }
 0x84a   : > { %1920 = vmatpush3.bf16.msra.mxu1 %v1919_v17  ;;  %1944 = vmatpush3.bf16.msra.mxu0 %v1943_v51 }
 0x8cf   : > { %v1348_v3 = vpop.xlane.xlu1 %1347 }
 0x8d0   : > { %v1350_v4 = vmul.f32 0.015625, %v1348_v3 }
 0x8d2   : > { %v2566_v5 = vsub.f32 %v1343_v1, %v1350_v4 }
 0x8d4   : > { %v1352_v6 = vmul.f32 %v2566_v5, %v2566_v5 }
 0x8d6   : > { %v1353_v0 = vsel %vm500_vm0, %v1352_v6, 0.0 }
 0x8d7   : > { %1354 = vadd.xlane.f32.xlu0 %v1353_v0 }
 0x964   : > { %v1355_v41 = vpop.xlane.xlu0 %1354 }
 0x965   : > { %v1356_v42 = vmul.f32 0.015625, %v1355_v41 }
 0x967   : > { %v1357_v43 = vadd.f32 1e-05, %v1356_v42 }
 0x969   : > { %2030 = vrsqrt.f32 %v1357_v43 }
 0x973   : > { %v2031_v44 = vpop.eup %2030 }
 0x974   : > { %v1359_v46 = vmul.f32 %v2031_v44, %v2566_v5 }
 0x976   : > { %v1366_v48 = vmul.f32 %v1706_v45, %v1359_v46 }
 0x978   : > { %v1373_v49 = vadd.f32 %v1707_v47, %v1366_v48 }
 0x97a   : > { %1844 = vmatmul.mubr.msk.f32.vlgmr.msra.gmra.mrb[14].mxu1 %vm500_vm0, %v1373_v49 }
 0xa4d   : > { %v1458_v53 = vpop.f32.mrb[14].mxu1 }
 0xa4e   : > { %v1459_v54 = vadd.f32 %v1708_v52, %v1458_v53  ;;  %v1845_v55 = vpop.f32.mrb[15].mxu1 }
 0xa50   : > { %v1462_v56 = vmax.f32 %v1459_v54, 0.0 }
 0xa52   : > { %1879 = vmatmul.mubr.f32.vlgmr.msra.gmra.mrb[6].mxu0 %v1462_v56 }
 0xb25   : > { %v1552_v58 = vpop.f32.mrb[6].mxu0 }
 0xb26   : > { %v1553_v59 = vadd.f32 %v1710_v57, %v1552_v58  ;;  %v1880_v60 = vpop.f32.mrb[7].mxu0 }
 0xb28   : > { %v1556_v61 = vadd.f32 %v1553_v59, %v1373_v49 }
 0xb2a   : > { %v1559_v62 = vsel %vm500_vm0, %v1556_v61, 0.0 }
 0xb2b   : > { %1560 = vadd.xlane.f32.xlu0 %v1559_v62 }
 0xbb8   : > { %v1561_v63 = vpop.xlane.xlu0 %1560 }
 0xbb9   : > { %v1562_v1 = vmul.f32 0.015625, %v1561_v63 }
 0xbbb   : > { %v1563_v2 = vsub.f32 %v1556_v61, %v1562_v1 }
 0xbbd   : > { %v1564_v3 = vmul.f32 %v1563_v2, %v1563_v2 }
 0xbbf   : > { %v1565_v4 = vsel %vm500_vm0, %v1564_v3, 0.0 }
 0xbc0   : > { %1566 = vadd.xlane.f32.xlu1 %v1565_v4 }
 0xc4d   : > { %v1567_v5 = vpop.xlane.xlu1 %1566 }
 0xc4e   : > { %v1568_v6 = vmul.f32 0.015625, %v1567_v5 }
 0xc50   : > { %v1569_v0 = vadd.f32 1e-05, %v1568_v6 }
 0xc52   : > { %2032 = vrsqrt.f32 %v1569_v0 }
 0xc5c   : > { %v2033_v7 = vpop.eup %2032 }
 0xc5d   : > { %v1571_v9 = vmul.f32 %v2033_v7, %v1563_v2 }
 0xc5f   : > { %v1578_v10 = vmul.f32 %v1711_v8, %v1571_v9 }
 0xc61   : > { %v1585_v11 = vadd.f32 %v1712_v25, %v1578_v10 }
 0xc63   : > { %1586 = vst.msk [vmem:[%s470_s30] sm:$0xff] %vm500_vm0, %v1585_v11 }
 0xc64   : > { %2105 = shalt.err (!%p2102_p7)
}
 0xc65   : > { %s2106_s13 = scalar_lea.hbm %s2657_s0, 128  ;;  %s2110_s21 = scalar_lea.hbm %s2745_s18, 256 }
 0xc66   : > { %p2107_p9 = scmp.ne.s32.totalorder %s2657_s0, %s2106_s13  ;;  %p2111_p0 = scmp.lt.u32.totalorder %s2657_s0, %s2745_s18 }
 0xc67   : > { %p2112_p11 = scmp.lt.u32.totalorder %s2110_s21, %s2106_s13  ;;  %p2114_p4 = scmp.lt.u32.totalorder %s2106_s13, %s2657_s0 }
 0xc68   : > { %p2108_p2 = pnand %p2107_p9, %p2340_p12 }
 0xc69   : > { %p2113_p1 = por %p2112_p11, %p2111_p0 }
 0xc6a   : > { %p2109_p5 = pneg %p2108_p2 }
 0xc6b   : > { %p2115_p6 = por %p2114_p4, %p2113_p1 }
 0xc6d   : > { %p2116_p8 = pnand %p2115_p6, %p2109_p5 }
 0xc6f   : > { %2119 = shalt.err (!%p2116_p8)
}
 0xc70   : > { %1951 = dma.vmem_to_hbm [thread:$0]  (%p2340_p12), %s2659_s19, 128, %s2657_s0, %s1588_s11  }
 0xc71 PF: > { %s2746_s14 = sld [smem:[#allocation11_spill]]  ;;  %s2747_s15 = sld [smem:[#allocation12_spill]] }
 0xc72   : > { %p2749_p13 = scmp.ge.s32.totalorder %s2162_s28, 2 }
 0xc77   : > { %s1613_s12 = sand.u32 1, %s2746_s14   ;;  %p2748_p10 = scmp.ne.s32.totalorder %s2747_s15, 0 }
 0xc78   : > { %s1614_s29 = scalar_lea.sflag [#allocation4], %s1613_s12 }
 0xc79   : > { %p1962_p3 = pnand %p2749_p13, %p2748_p10 }
 0xc7b   : > { %2145 = dma.done.wait (!%p1962_p3), %s1614_s29, 128  }
 0xc7c   : > { %2147 = vsyncadd (!%p1962_p3), %s1614_s29, 4294967168  ;;  %s2750_s28 = sld [smem:[#allocation13_spill]]  ;;  %s2751_s25 = smov %s2154_s26 }
 0xc7d   : > { %s2752_s26 = smov %s2158_s27  ;;  %s2753_s27 = smov %s2336_s20 }
 0xc82   : > { %p27_p7 = scmp.ge.s32.totalorder %s2750_s28, 4  }
 0xc84   :  { %29 = sbr.rel (!%p27_p7) target bundleno = 11 (0xb), region = 121 }
 0xc8b   :  { %1619 = vsyncpa [#allocation3], 1 }
 0xc8c   :  { %1621 = vsyncpa [#allocation3 + $0x1], 1 }
 0xc8d   :  { %1622 = vsyncpa [#allocation6], 1 }
 0xc8e   :  { %1623 = vsyncpa [#allocation4], 1 }
 0xc8f   :  { %1625 = vsyncpa [#allocation4 + $0x1], 1 }

</bundles_post_ra>
